<compile_context>
chip_gen: v6e
topology: v6e:2x2x1
jax: 0.10.0
libtpu: 0.0.40
codegen_flags: <defaults>
</compile_context>

<pallas_src>
import functools

import numpy as np
import jax
import jax.numpy as jnp
from jax.experimental import pallas as pl
from jax.experimental.pallas import tpu as pltpu


def mha_kernel(x_ref, mem_ref, wq_ref, bq_ref, wkv_ref, bkv_ref, wo_ref, bo_ref,
               out_ref, slab_ref, *, head, d_k, scale, matmul_dtype):
    d_model = head * d_k

    x = x_ref[0].astype(matmul_dtype)      # (TQ, d_model)
    mem = mem_ref[0].astype(matmul_dtype)  # (Skv, d_model)

    # Fused projections for ALL heads at once (wide-N matmuls fill the MXU).
    # f32 accumulation; biases added in f32.
    q_all = jnp.dot(x, wq_ref[...], preferred_element_type=jnp.float32) + bq_ref[...]
    kv_all = jnp.dot(mem, wkv_ref[...], preferred_element_type=jnp.float32) + bkv_ref[...]
    k_all = kv_all[:, :d_model]            # (Skv, d_model) f32
    v_all = kv_all[:, d_model:]            # (Skv, d_model) f32

    # Per-head attention (heads are few; static unrolled loop).
    # TODO(synk): boolean attention-mask path (masked_fill_) not implemented;
    #             this is the mask=None forward path of the reference module.
    # TODO(synk): for very long memory, tile Skv with an online-softmax inner
    #             loop instead of holding the full (Skv, d_model) K/V in VMEM.
    for h in range(head):
        lo = h * d_k
        q_h = q_all[:, lo:lo + d_k].astype(matmul_dtype)   # (TQ, d_k)
        k_h = k_all[:, lo:lo + d_k].astype(matmul_dtype)   # (Skv, d_k)
        v_h = v_all[:, lo:lo + d_k].astype(matmul_dtype)   # (Skv, d_k)

        # q @ k^T without materializing a transpose: contract last dims.
        s = jax.lax.dot_general(q_h, k_h, (((1,), (1,)), ((), ())),
                                preferred_element_type=jnp.float32) * scale
        # Softmax in f32 (VPU/EUP), max-subtracted for stability.
        s = s - jnp.max(s, axis=-1, keepdims=True)
        p = jnp.exp(s)
        p = p * pl.reciprocal(jnp.sum(p, axis=-1, keepdims=True), approx=True)

        attn = jnp.dot(p.astype(matmul_dtype), v_h,
                       preferred_element_type=jnp.float32)  # (TQ, d_k) f32
        # Stash this head's output at lane offset h*d_k of the combine slab.
        slab_ref[:, lo:lo + d_k] = attn

    # One full-contraction-depth output projection for all heads together.
    out = jnp.dot(slab_ref[...].astype(matmul_dtype), wo_ref[...],
                  preferred_element_type=jnp.float32) + bo_ref[...]
    out_ref[0] = out.astype(out_ref.dtype)


def prepare_mha_params(params, matmul_dtype=jnp.bfloat16):
    """One-time parameter preparation (hoisted out of the per-call path).

    Fuses Wk/Wv into a single (d_model, 2*d_model) weight, casts MXU operands
    to `matmul_dtype`, keeps biases in f32 (they are added to f32 accumulators).
    """
    d_model = params["wq"].shape[0]
    return {
        "wq": params["wq"].astype(matmul_dtype),
        "bq": params["bq"].reshape(1, d_model).astype(jnp.float32),
        "wkv": jnp.concatenate([params["wk"], params["wv"]], axis=1).astype(matmul_dtype),
        "bkv": jnp.concatenate([params["bk"], params["bv"]]).reshape(1, 2 * d_model)
                  .astype(jnp.float32),
        "wo": params["wo"].astype(matmul_dtype),
        "bo": params["bo"].reshape(1, d_model).astype(jnp.float32),
    }


def multi_head_attention(x, memory, prepared, head, *, block_q=None,
                         matmul_dtype=jnp.bfloat16):
    B, Sq, d_model = x.shape
    _, Skv, _ = memory.shape
    assert d_model % head == 0
    d_k = d_model // head

    if block_q is None:
        block_q = Sq                      # single q-tile (no K/V recompute)
    assert Sq % block_q == 0 and (block_q == Sq or block_q % 8 == 0)
    num_q = Sq // block_q
    scale = 1.0 / float(np.sqrt(d_k))

    kernel = functools.partial(mha_kernel, head=head, d_k=d_k, scale=scale,
                               matmul_dtype=matmul_dtype)

    # Explicit VMEM budget (double-buffered activation blocks + resident weights
    # + slab + headroom for f32 intermediates), clipped to be safe on v7x's
    # 64 MiB physical VMEM; raises v5e's 16 MiB scoped default when needed.
    a_item = jnp.dtype(x.dtype).itemsize
    w_item = jnp.dtype(matmul_dtype).itemsize
    est = (2 * a_item * d_model * (2 * block_q + Skv)            # x, out, memory (x2 buf)
           + 2 * w_item * 4 * d_model * d_model                  # wq + wkv + wo
           + 4 * block_q * d_model                               # combine slab (f32)
           + 2 * 4 * d_model * (block_q + 2 * Skv))              # f32 q_all/kv_all headroom
    vmem_limit = int(min(64 * 1024 * 1024, max(32 * 1024 * 1024, 2 * est)))

    grid = (B, num_q)
    out = pl.pallas_call(
        kernel,
        out_shape=jax.ShapeDtypeStruct((B, Sq, d_model), x.dtype),
        grid_spec=pltpu.PrefetchScalarGridSpec(
            num_scalar_prefetch=0,
            grid=grid,
            in_specs=[
                pl.BlockSpec((1, block_q, d_model), lambda b, q: (b, q, 0)),   # x (q-tile)
                pl.BlockSpec((1, Skv, d_model), lambda b, q: (b, 0, 0)),       # memory
                pl.BlockSpec((d_model, d_model), lambda b, q: (0, 0)),         # Wq  (resident)
                pl.BlockSpec((1, d_model), lambda b, q: (0, 0)),               # bq
                pl.BlockSpec((d_model, 2 * d_model), lambda b, q: (0, 0)),     # Wkv (resident)
                pl.BlockSpec((1, 2 * d_model), lambda b, q: (0, 0)),           # bkv
                pl.BlockSpec((d_model, d_model), lambda b, q: (0, 0)),         # Wo  (resident)
                pl.BlockSpec((1, d_model), lambda b, q: (0, 0)),               # bo
            ],
            out_specs=pl.BlockSpec((1, block_q, d_model), lambda b, q: (b, q, 0)),
            scratch_shapes=[pltpu.VMEM((block_q, d_model), jnp.float32)],      # combine slab
        ),
        compiler_params=pltpu.CompilerParams(
            dimension_semantics=("parallel", "parallel"),
            vmem_limit_bytes=vmem_limit),
    )(x, memory, prepared["wq"], prepared["bq"], prepared["wkv"],
      prepared["bkv"], prepared["wo"], prepared["bo"])
    return out


def reference_mha(x, memory, params, head):
    """Pure-JAX f32 reference mirroring the PyTorch module (mask=None)."""
    B, Sq, D = x.shape
    d_k = D // head
    q = x @ params["wq"] + params["bq"]
    k = memory @ params["wk"] + params["bk"]
    v = memory @ params["wv"] + params["bv"]

    def split(t):
        b, s, _ = t.shape
        return t.reshape(b, s, head, d_k).transpose(0, 2, 1, 3)

    q, k, v = split(q), split(k), split(v)
    s = jnp.einsum("bhqd,bhkd->bhqk", q, k) / np.sqrt(d_k)
    w = jax.nn.softmax(s, axis=-1)
    o = jnp.einsum("bhqk,bhkd->bhqd", w, v)
    o = o.transpose(0, 2, 1, 3).reshape(B, Sq, D)
    return o @ params["wo"] + params["bo"]


def init_params(key, d_model):
    # Deterministic init mimicking nn.Linear default (uniform +-1/sqrt(fan_in)).
    bound = 1.0 / np.sqrt(d_model)
    ks = jax.random.split(key, 8)
    u = lambda k, shape: jax.random.uniform(k, shape, jnp.float32, -bound, bound)
    return {
        "wq": u(ks[0], (d_model, d_model)), "bq": u(ks[1], (d_model,)),
        "wk": u(ks[2], (d_model, d_model)), "bk": u(ks[3], (d_model,)),
        "wv": u(ks[4], (d_model, d_model)), "bv": u(ks[5], (d_model,)),
        "wo": u(ks[6], (d_model, d_model)), "bo": u(ks[7], (d_model,)),
    }


if __name__ == "__main__":
    B, Sq, Skv, d_model, head = 2, 8, 8, 32, 4

    key = jax.random.PRNGKey(0)
    kx, km, kp = jax.random.split(key, 3)
    x = jax.random.normal(kx, (B, Sq, d_model), jnp.float32)
    memory = jax.random.normal(km, (B, Skv, d_model), jnp.float32)
    params = init_params(kp, d_model)

    ref = reference_mha(x, memory, params, head)

    # 1) f32 MXU-operand path: tight numerical check.
    prep32 = prepare_mha_params(params, matmul_dtype=jnp.float32)
    out32 = jax.block_until_ready(
        multi_head_attention(x, memory, prep32, head, matmul_dtype=jnp.float32))
    np.testing.assert_allclose(np.asarray(out32), np.asarray(ref),
                               rtol=2e-3, atol=2e-3)

    # 2) Default fast path: bf16 MXU operands, f32 accumulation + f32 softmax.
    prep16 = prepare_mha_params(params, matmul_dtype=jnp.bfloat16)
    out16 = jax.block_until_ready(
        multi_head_attention(x, memory, prep16, head, matmul_dtype=jnp.bfloat16))
    np.testing.assert_allclose(np.asarray(out16), np.asarray(ref),
                               rtol=2e-2, atol=2e-2)

    print("KERNEL_OK")
</pallas_src>

<mosaic_0001>
module attributes {stable_mosaic.version = 11 : i64} {
  func.func @mha_kernel(%arg0: i32, %arg1: i32, %arg2: memref<1x8x32xf32, #tpu.memory_space<vmem>>, %arg3: memref<1x8x32xf32, #tpu.memory_space<vmem>>, %arg4: memref<32x32xf32, #tpu.memory_space<vmem>>, %arg5: memref<1x32xf32, #tpu.memory_space<vmem>>, %arg6: memref<32x64xf32, #tpu.memory_space<vmem>>, %arg7: memref<1x64xf32, #tpu.memory_space<vmem>>, %arg8: memref<32x32xf32, #tpu.memory_space<vmem>>, %arg9: memref<1x32xf32, #tpu.memory_space<vmem>>, %arg10: memref<1x8x32xf32, #tpu.memory_space<vmem>>, %arg11: memref<8x32xf32, #tpu.memory_space<vmem>>) attributes {dimension_semantics = [#tpu.dimension_semantics<parallel>, #tpu.dimension_semantics<parallel>], iteration_bounds = array<i64: 2, 1>, scalar_prefetch = 0 : i64, scratch_operands = 1 : i64, tpu.core_type = #tpu.core_type<tc>, window_params = [{transform_indices = @transform_0, window_bounds = array<i64: 1, 8, 32>}, {transform_indices = @transform_1, window_bounds = array<i64: 1, 8, 32>}, {pipeline_mode = #tpu.pipeline_mode<synchronous>, transform_indices = @transform_2, window_bounds = array<i64: 32, 32>}, {pipeline_mode = #tpu.pipeline_mode<synchronous>, transform_indices = @transform_3, window_bounds = array<i64: 1, 32>}, {pipeline_mode = #tpu.pipeline_mode<synchronous>, transform_indices = @transform_4, window_bounds = array<i64: 32, 64>}, {pipeline_mode = #tpu.pipeline_mode<synchronous>, transform_indices = @transform_5, window_bounds = array<i64: 1, 64>}, {pipeline_mode = #tpu.pipeline_mode<synchronous>, transform_indices = @transform_6, window_bounds = array<i64: 32, 32>}, {pipeline_mode = #tpu.pipeline_mode<synchronous>, transform_indices = @transform_7, window_bounds = array<i64: 1, 32>}, {transform_indices = @transform_8, window_bounds = array<i64: 1, 8, 32>}]} {
    %c0 = arith.constant 0 : index
    %c0_0 = arith.constant 0 : index
    %c0_1 = arith.constant 0 : index
    %0 = vector.load %arg2[%c0, %c0_0, %c0_1] : memref<1x8x32xf32, #tpu.memory_space<vmem>>, vector<1x8x32xf32>
    %1 = vector.shape_cast %0 : vector<1x8x32xf32> to vector<8x32xf32>
    %c0_2 = arith.constant 0 : index
    %c0_3 = arith.constant 0 : index
    %c0_4 = arith.constant 0 : index
    %2 = vector.load %arg3[%c0_2, %c0_3, %c0_4] : memref<1x8x32xf32, #tpu.memory_space<vmem>>, vector<1x8x32xf32>
    %3 = vector.shape_cast %2 : vector<1x8x32xf32> to vector<8x32xf32>
    %c0_5 = arith.constant 0 : index
    %c0_6 = arith.constant 0 : index
    %4 = vector.load %arg4[%c0_5, %c0_6] : memref<32x32xf32, #tpu.memory_space<vmem>>, vector<32x32xf32>
    %cst = arith.constant dense<0.000000e+00> : vector<8x32xf32>
    %5 = tpu.matmul %1, %4, %cst {dimension_numbers = #tpu.dot_dimension_numbers<[1], [0], [0], [1], [0, 0, 1, 1], [], []>} : vector<8x32xf32>, vector<32x32xf32>, vector<8x32xf32> -> vector<8x32xf32>
    %c0_7 = arith.constant 0 : index
    %c0_8 = arith.constant 0 : index
    %6 = vector.load %arg5[%c0_7, %c0_8] : memref<1x32xf32, #tpu.memory_space<vmem>>, vector<1x32xf32>
    %7 = vector.broadcast %6 : vector<1x32xf32> to vector<8x32xf32>
    %8 = arith.addf %5, %7 : vector<8x32xf32>
    %c0_9 = arith.constant 0 : index
    %c0_10 = arith.constant 0 : index
    %9 = vector.load %arg6[%c0_9, %c0_10] : memref<32x64xf32, #tpu.memory_space<vmem>>, vector<32x64xf32>
    %cst_11 = arith.constant dense<0.000000e+00> : vector<8x64xf32>
    %10 = tpu.matmul %3, %9, %cst_11 {dimension_numbers = #tpu.dot_dimension_numbers<[1], [0], [0], [1], [0, 0, 1, 1], [], []>} : vector<8x32xf32>, vector<32x64xf32>, vector<8x64xf32> -> vector<8x64xf32>
    %c0_12 = arith.constant 0 : index
    %c0_13 = arith.constant 0 : index
    %11 = vector.load %arg7[%c0_12, %c0_13] : memref<1x64xf32, #tpu.memory_space<vmem>>, vector<1x64xf32>
    %12 = vector.broadcast %11 : vector<1x64xf32> to vector<8x64xf32>
    %13 = arith.addf %10, %12 : vector<8x64xf32>
    %14 = vector.extract_strided_slice %13 {offsets = [0, 0], sizes = [8, 32], strides = [1, 1]} : vector<8x64xf32> to vector<8x32xf32>
    %15 = vector.extract_strided_slice %13 {offsets = [0, 32], sizes = [8, 32], strides = [1, 1]} : vector<8x64xf32> to vector<8x32xf32>
    %16 = vector.extract_strided_slice %8 {offsets = [0, 0], sizes = [8, 8], strides = [1, 1]} : vector<8x32xf32> to vector<8x8xf32>
    %17 = vector.extract_strided_slice %14 {offsets = [0, 0], sizes = [8, 8], strides = [1, 1]} : vector<8x32xf32> to vector<8x8xf32>
    %18 = vector.extract_strided_slice %15 {offsets = [0, 0], sizes = [8, 8], strides = [1, 1]} : vector<8x32xf32> to vector<8x8xf32>
    %cst_14 = arith.constant dense<0.000000e+00> : vector<8x8xf32>
    %19 = tpu.matmul %16, %17, %cst_14 {dimension_numbers = #tpu.dot_dimension_numbers<[1], [1], [0], [0], [0, 0, 1, 0], [], []>} : vector<8x8xf32>, vector<8x8xf32>, vector<8x8xf32> -> vector<8x8xf32>
    %cst_15 = arith.constant 0.353553385 : f32
    %20 = vector.broadcast %cst_15 : f32 to vector<8x8xf32>
    %21 = arith.mulf %19, %20 : vector<8x8xf32>
    %cst_16 = arith.constant dense<0xFF800000> : vector<8xf32>
    %22 = vector.multi_reduction <maximumf>, %21, %cst_16 [1] : vector<8x8xf32> to vector<8xf32>
    %23 = vector.shape_cast %22 : vector<8xf32> to vector<8x1xf32>
    %24 = vector.broadcast %23 : vector<8x1xf32> to vector<8x8xf32>
    %25 = arith.subf %21, %24 : vector<8x8xf32>
    %26 = math.exp %25 : vector<8x8xf32>
    %cst_17 = arith.constant dense<0.000000e+00> : vector<8xf32>
    %27 = vector.multi_reduction <add>, %26, %cst_17 [1] : vector<8x8xf32> to vector<8xf32>
    %28 = vector.shape_cast %27 : vector<8xf32> to vector<8x1xf32>
    %29 = tpu.reciprocal %28 {approx = true} : vector<8x1xf32> -> vector<8x1xf32>
    %30 = vector.broadcast %29 : vector<8x1xf32> to vector<8x8xf32>
    %31 = arith.mulf %26, %30 : vector<8x8xf32>
    %cst_18 = arith.constant dense<0.000000e+00> : vector<8x8xf32>
    %32 = tpu.matmul %31, %18, %cst_18 {dimension_numbers = #tpu.dot_dimension_numbers<[1], [0], [0], [1], [0, 0, 1, 1], [], []>} : vector<8x8xf32>, vector<8x8xf32>, vector<8x8xf32> -> vector<8x8xf32>
    %c0_19 = arith.constant 0 : index
    %c0_20 = arith.constant 0 : index
    %33 = vector.load %arg11[%c0_19, %c0_20] : memref<8x32xf32, #tpu.memory_space<vmem>>, vector<8x8xf32>
    tpu.vector_store %arg11[%c0_19, %c0_20], %32 {strides = array<i32>} : memref<8x32xf32, #tpu.memory_space<vmem>>, vector<8x8xf32>,
    %34 = vector.extract_strided_slice %8 {offsets = [0, 8], sizes = [8, 8], strides = [1, 1]} : vector<8x32xf32> to vector<8x8xf32>
    %35 = vector.extract_strided_slice %14 {offsets = [0, 8], sizes = [8, 8], strides = [1, 1]} : vector<8x32xf32> to vector<8x8xf32>
    %36 = vector.extract_strided_slice %15 {offsets = [0, 8], sizes = [8, 8], strides = [1, 1]} : vector<8x32xf32> to vector<8x8xf32>
    %cst_21 = arith.constant dense<0.000000e+00> : vector<8x8xf32>
    %37 = tpu.matmul %34, %35, %cst_21 {dimension_numbers = #tpu.dot_dimension_numbers<[1], [1], [0], [0], [0, 0, 1, 0], [], []>} : vector<8x8xf32>, vector<8x8xf32>, vector<8x8xf32> -> vector<8x8xf32>
    %cst_22 = arith.constant 0.353553385 : f32
    %38 = vector.broadcast %cst_22 : f32 to vector<8x8xf32>
    %39 = arith.mulf %37, %38 : vector<8x8xf32>
    %cst_23 = arith.constant dense<0xFF800000> : vector<8xf32>
    %40 = vector.multi_reduction <maximumf>, %39, %cst_23 [1] : vector<8x8xf32> to vector<8xf32>
    %41 = vector.shape_cast %40 : vector<8xf32> to vector<8x1xf32>
    %42 = vector.broadcast %41 : vector<8x1xf32> to vector<8x8xf32>
    %43 = arith.subf %39, %42 : vector<8x8xf32>
    %44 = math.exp %43 : vector<8x8xf32>
    %cst_24 = arith.constant dense<0.000000e+00> : vector<8xf32>
    %45 = vector.multi_reduction <add>, %44, %cst_24 [1] : vector<8x8xf32> to vector<8xf32>
    %46 = vector.shape_cast %45 : vector<8xf32> to vector<8x1xf32>
    %47 = tpu.reciprocal %46 {approx = true} : vector<8x1xf32> -> vector<8x1xf32>
    %48 = vector.broadcast %47 : vector<8x1xf32> to vector<8x8xf32>
    %49 = arith.mulf %44, %48 : vector<8x8xf32>
    %cst_25 = arith.constant dense<0.000000e+00> : vector<8x8xf32>
    %50 = tpu.matmul %49, %36, %cst_25 {dimension_numbers = #tpu.dot_dimension_numbers<[1], [0], [0], [1], [0, 0, 1, 1], [], []>} : vector<8x8xf32>, vector<8x8xf32>, vector<8x8xf32> -> vector<8x8xf32>
    %c0_26 = arith.constant 0 : index
    %c8 = arith.constant 8 : index
    %51 = vector.load %arg11[%c0_26, %c8] : memref<8x32xf32, #tpu.memory_space<vmem>>, vector<8x8xf32>
    tpu.vector_store %arg11[%c0_26, %c8], %50 {strides = array<i32>} : memref<8x32xf32, #tpu.memory_space<vmem>>, vector<8x8xf32>,
    %52 = vector.extract_strided_slice %8 {offsets = [0, 16], sizes = [8, 8], strides = [1, 1]} : vector<8x32xf32> to vector<8x8xf32>
    %53 = vector.extract_strided_slice %14 {offsets = [0, 16], sizes = [8, 8], strides = [1, 1]} : vector<8x32xf32> to vector<8x8xf32>
    %54 = vector.extract_strided_slice %15 {offsets = [0, 16], sizes = [8, 8], strides = [1, 1]} : vector<8x32xf32> to vector<8x8xf32>
    %cst_27 = arith.constant dense<0.000000e+00> : vector<8x8xf32>
    %55 = tpu.matmul %52, %53, %cst_27 {dimension_numbers = #tpu.dot_dimension_numbers<[1], [1], [0], [0], [0, 0, 1, 0], [], []>} : vector<8x8xf32>, vector<8x8xf32>, vector<8x8xf32> -> vector<8x8xf32>
    %cst_28 = arith.constant 0.353553385 : f32
    %56 = vector.broadcast %cst_28 : f32 to vector<8x8xf32>
    %57 = arith.mulf %55, %56 : vector<8x8xf32>
    %cst_29 = arith.constant dense<0xFF800000> : vector<8xf32>
    %58 = vector.multi_reduction <maximumf>, %57, %cst_29 [1] : vector<8x8xf32> to vector<8xf32>
    %59 = vector.shape_cast %58 : vector<8xf32> to vector<8x1xf32>
    %60 = vector.broadcast %59 : vector<8x1xf32> to vector<8x8xf32>
    %61 = arith.subf %57, %60 : vector<8x8xf32>
    %62 = math.exp %61 : vector<8x8xf32>
    %cst_30 = arith.constant dense<0.000000e+00> : vector<8xf32>
    %63 = vector.multi_reduction <add>, %62, %cst_30 [1] : vector<8x8xf32> to vector<8xf32>
    %64 = vector.shape_cast %63 : vector<8xf32> to vector<8x1xf32>
    %65 = tpu.reciprocal %64 {approx = true} : vector<8x1xf32> -> vector<8x1xf32>
    %66 = vector.broadcast %65 : vector<8x1xf32> to vector<8x8xf32>
    %67 = arith.mulf %62, %66 : vector<8x8xf32>
    %cst_31 = arith.constant dense<0.000000e+00> : vector<8x8xf32>
    %68 = tpu.matmul %67, %54, %cst_31 {dimension_numbers = #tpu.dot_dimension_numbers<[1], [0], [0], [1], [0, 0, 1, 1], [], []>} : vector<8x8xf32>, vector<8x8xf32>, vector<8x8xf32> -> vector<8x8xf32>
    %c0_32 = arith.constant 0 : index
    %c16 = arith.constant 16 : index
    %69 = vector.load %arg11[%c0_32, %c16] : memref<8x32xf32, #tpu.memory_space<vmem>>, vector<8x8xf32>
    tpu.vector_store %arg11[%c0_32, %c16], %68 {strides = array<i32>} : memref<8x32xf32, #tpu.memory_space<vmem>>, vector<8x8xf32>,
    %70 = vector.extract_strided_slice %8 {offsets = [0, 24], sizes = [8, 8], strides = [1, 1]} : vector<8x32xf32> to vector<8x8xf32>
    %71 = vector.extract_strided_slice %14 {offsets = [0, 24], sizes = [8, 8], strides = [1, 1]} : vector<8x32xf32> to vector<8x8xf32>
    %72 = vector.extract_strided_slice %15 {offsets = [0, 24], sizes = [8, 8], strides = [1, 1]} : vector<8x32xf32> to vector<8x8xf32>
    %cst_33 = arith.constant dense<0.000000e+00> : vector<8x8xf32>
    %73 = tpu.matmul %70, %71, %cst_33 {dimension_numbers = #tpu.dot_dimension_numbers<[1], [1], [0], [0], [0, 0, 1, 0], [], []>} : vector<8x8xf32>, vector<8x8xf32>, vector<8x8xf32> -> vector<8x8xf32>
    %cst_34 = arith.constant 0.353553385 : f32
    %74 = vector.broadcast %cst_34 : f32 to vector<8x8xf32>
    %75 = arith.mulf %73, %74 : vector<8x8xf32>
    %cst_35 = arith.constant dense<0xFF800000> : vector<8xf32>
    %76 = vector.multi_reduction <maximumf>, %75, %cst_35 [1] : vector<8x8xf32> to vector<8xf32>
    %77 = vector.shape_cast %76 : vector<8xf32> to vector<8x1xf32>
    %78 = vector.broadcast %77 : vector<8x1xf32> to vector<8x8xf32>
    %79 = arith.subf %75, %78 : vector<8x8xf32>
    %80 = math.exp %79 : vector<8x8xf32>
    %cst_36 = arith.constant dense<0.000000e+00> : vector<8xf32>
    %81 = vector.multi_reduction <add>, %80, %cst_36 [1] : vector<8x8xf32> to vector<8xf32>
    %82 = vector.shape_cast %81 : vector<8xf32> to vector<8x1xf32>
    %83 = tpu.reciprocal %82 {approx = true} : vector<8x1xf32> -> vector<8x1xf32>
    %84 = vector.broadcast %83 : vector<8x1xf32> to vector<8x8xf32>
    %85 = arith.mulf %80, %84 : vector<8x8xf32>
    %cst_37 = arith.constant dense<0.000000e+00> : vector<8x8xf32>
    %86 = tpu.matmul %85, %72, %cst_37 {dimension_numbers = #tpu.dot_dimension_numbers<[1], [0], [0], [1], [0, 0, 1, 1], [], []>} : vector<8x8xf32>, vector<8x8xf32>, vector<8x8xf32> -> vector<8x8xf32>
    %c0_38 = arith.constant 0 : index
    %c24 = arith.constant 24 : index
    %87 = vector.load %arg11[%c0_38, %c24] : memref<8x32xf32, #tpu.memory_space<vmem>>, vector<8x8xf32>
    tpu.vector_store %arg11[%c0_38, %c24], %86 {strides = array<i32>} : memref<8x32xf32, #tpu.memory_space<vmem>>, vector<8x8xf32>,
    %c0_39 = arith.constant 0 : index
    %c0_40 = arith.constant 0 : index
    %88 = vector.load %arg11[%c0_39, %c0_40] : memref<8x32xf32, #tpu.memory_space<vmem>>, vector<8x32xf32>
    %c0_41 = arith.constant 0 : index
    %c0_42 = arith.constant 0 : index
    %89 = vector.load %arg8[%c0_41, %c0_42] : memref<32x32xf32, #tpu.memory_space<vmem>>, vector<32x32xf32>
    %cst_43 = arith.constant dense<0.000000e+00> : vector<8x32xf32>
    %90 = tpu.matmul %88, %89, %cst_43 {dimension_numbers = #tpu.dot_dimension_numbers<[1], [0], [0], [1], [0, 0, 1, 1], [], []>} : vector<8x32xf32>, vector<32x32xf32>, vector<8x32xf32> -> vector<8x32xf32>
    %c0_44 = arith.constant 0 : index
    %c0_45 = arith.constant 0 : index
    %91 = vector.load %arg9[%c0_44, %c0_45] : memref<1x32xf32, #tpu.memory_space<vmem>>, vector<1x32xf32>
    %92 = vector.broadcast %91 : vector<1x32xf32> to vector<8x32xf32>
    %93 = arith.addf %90, %92 : vector<8x32xf32>
    %c0_46 = arith.constant 0 : index
    %c0_47 = arith.constant 0 : index
    %c0_48 = arith.constant 0 : index
    %94 = vector.load %arg10[%c0_46, %c0_47, %c0_48] : memref<1x8x32xf32, #tpu.memory_space<vmem>>, vector<1x8x32xf32>
    %95 = vector.shape_cast %94 : vector<1x8x32xf32> to vector<8x32xf32>
    %96 = vector.shape_cast %93 : vector<8x32xf32> to vector<1x8x32xf32>
    tpu.vector_store %arg10[%c0_46, %c0_47, %c0_48], %96 {strides = array<i32>} : memref<1x8x32xf32, #tpu.memory_space<vmem>>, vector<1x8x32xf32>,
    return
  }
  func.func @transform_0(%arg0: i32, %arg1: i32) -> (i32, i32, i32) {
    %c0_i32 = arith.constant 0 : i32
    %c0_i32_0 = arith.constant 0 : i32
    return %arg0, %arg1, %c0_i32 : i32, i32, i32
  }
  func.func @transform_1(%arg0: i32, %arg1: i32) -> (i32, i32, i32) {
    %c0_i32 = arith.constant 0 : i32
    %c0_i32_0 = arith.constant 0 : i32
    %c0_i32_1 = arith.constant 0 : i32
    return %arg0, %c0_i32, %c0_i32_0 : i32, i32, i32
  }
  func.func @transform_2(%arg0: i32, %arg1: i32) -> (i32, i32) {
    %c0_i32 = arith.constant 0 : i32
    %c0_i32_0 = arith.constant 0 : i32
    %c0_i32_1 = arith.constant 0 : i32
    return %c0_i32, %c0_i32_0 : i32, i32
  }
  func.func @transform_3(%arg0: i32, %arg1: i32) -> (i32, i32) {
    %c0_i32 = arith.constant 0 : i32
    %c0_i32_0 = arith.constant 0 : i32
    %c0_i32_1 = arith.constant 0 : i32
    return %c0_i32, %c0_i32_0 : i32, i32
  }
  func.func @transform_4(%arg0: i32, %arg1: i32) -> (i32, i32) {
    %c0_i32 = arith.constant 0 : i32
    %c0_i32_0 = arith.constant 0 : i32
    %c0_i32_1 = arith.constant 0 : i32
    return %c0_i32, %c0_i32_0 : i32, i32
  }
  func.func @transform_5(%arg0: i32, %arg1: i32) -> (i32, i32) {
    %c0_i32 = arith.constant 0 : i32
    %c0_i32_0 = arith.constant 0 : i32
    %c0_i32_1 = arith.constant 0 : i32
    return %c0_i32, %c0_i32_0 : i32, i32
  }
  func.func @transform_6(%arg0: i32, %arg1: i32) -> (i32, i32) {
    %c0_i32 = arith.constant 0 : i32
    %c0_i32_0 = arith.constant 0 : i32
    %c0_i32_1 = arith.constant 0 : i32
    return %c0_i32, %c0_i32_0 : i32, i32
  }
  func.func @transform_7(%arg0: i32, %arg1: i32) -> (i32, i32) {
    %c0_i32 = arith.constant 0 : i32
    %c0_i32_0 = arith.constant 0 : i32
    %c0_i32_1 = arith.constant 0 : i32
    return %c0_i32, %c0_i32_0 : i32, i32
  }
  func.func @transform_8(%arg0: i32, %arg1: i32) -> (i32, i32, i32) {
    %c0_i32 = arith.constant 0 : i32
    %c0_i32_0 = arith.constant 0 : i32
    return %arg0, %arg1, %c0_i32 : i32, i32, i32
  }
}

</mosaic_0001>

<bundles_post_ra>
// kernel: tpu_custom_call.1
= control target key start
LH: loop header
LB: loop body
LE: loop exit
PB: predicated region body
PF: predicated region fallthrough
CT: control target
= control target key end

     0   :  { %s2371_s0 = inlined_call_operand.hbm [shape: f32[2,8,32], index: 0, kind: input, shape index: {}]   ;;  %s2372_s1 = inlined_call_operand.hbm [shape: f32[2,8,32], index: 1, kind: input, shape index: {}]   ;;  %s2373_s2 = inlined_call_operand.hbm [shape: f32[32,32], index: 2, kind: input, shape index: {}]   ;;  %s2374_s3 = inlined_call_operand.vmem [shape: f32[1,32], index: 3, kind: input, shape index: {}]   ;;  %s2375_s4 = inlined_call_operand.hbm [shape: f32[32,64], index: 4, kind: input, shape index: {}]   ;;  %s2376_s5 = inlined_call_operand.vmem [shape: f32[1,64], index: 5, kind: input, shape index: {}]   ;;  %s2377_s6 = inlined_call_operand.hbm [shape: f32[32,32], index: 6, kind: input, shape index: {}]   ;;  %s2378_s7 = inlined_call_operand.vmem [shape: f32[1,32], index: 7, kind: input, shape index: {}]   ;;  %s2379_s8 = inlined_call_operand.hbm [shape: f32[2,8,32], index: 8, kind: output, shape index: {}]  }
   0x1   :  { %2384 = sst [smem:[#allocation20_spill]] %s2371_s0 }
   0x2   :  { %2385 = sst [smem:[#allocation21_spill]] %s2373_s2 }
   0x3   :  { %2386 = sst [smem:[#allocation22_spill]] %s2375_s4 }
   0x4   :  { %2387 = sst [smem:[#allocation23_spill]] %s2377_s6 }
   0x5   :  { %13 = vsyncpa [#allocation4], 0 }
   0x6   :  { %15 = vsyncpa [#allocation4 + $0x1], 0 }
   0x7   :  { %16 = vsyncpa [#allocation7], 0 }
   0x8   :  { %18 = vsyncpa [#allocation7 + $0x1], 0 }
   0x9   :  { %19 = vsyncpa [#allocation10], 0 }
   0xa   :  { %20 = vsyncpa [#allocation5], 0 }
   0xb   :  { %22 = vsyncpa [#allocation5 + $0x1], 0  ;;  %s2068_s27 = smov 0   ;;  %s2070_s28 = smov 0  }
   0xc   :  { %s2072_s29 = smov 0   ;;  %s2074_s30 = smov 0  }
   0xd   :  { %s2076_s9 = smov 0   ;;  %s2078_s10 = smov 0  }
   0xe LB: > { %s2099_s11 = sadd.s32 4294967295, %s2001_s10   ;;  %s1504_s12 = sadd.s32 4294967294, %s2001_s10   ;;  %s2001_s10 = sphi %s2078_s10, %s28_s10   ;;  %s1997_s9 = sphi %s2076_s9, %s2414_s9   ;;  %s1993_s30 = sphi %s2074_s30, %s2413_s30   ;;  %s1989_s29 = sphi %s2072_s29, %s2412_s29   ;;  %s1985_s28 = sphi %s2070_s28, %s2411_s28   ;;  %s1981_s27 = sphi %s2068_s27, %s2410_s27  }
   0xf   : > { %p62_p0 = scmp.ne.s32.totalorder %s1985_s28, %s1981_s27  ;;  %p2380_p1 = scmp.eq.s32.totalorder %s2099_s11, 0 }
  0x10   : > { %p246_p3 = scmp.eq.s32.totalorder %s1504_s12, 1  ;;  %p1505_p5 = scmp.ge.s32.totalorder %s2001_s10, 1 }
  0x11   : > { %p2108_p4 = por %p2380_p1, %p62_p0  ;;  %p253_p7 = scmp.lt.s32.totalorder %s2001_s10, 3 }
  0x12   : > { %p2113_p6 = por %p246_p3, %p62_p0  ;;  %s2003_s16 = smov [#allocation8]  }
  0x13   : > { %s2388_s13 = scalar_select %p2108_p4, 1, 0 }
  0x14   : > { %s2389_s14 = scalar_select %p2113_p6, 1, 0 }
  0x15   : > { %p2118_p8 = pnand %p1505_p5, %p253_p7  ;;  %s265_s17 = sshll.u32 %s2003_s16, 4  ;;  %s266_s17 = int_to_ptr.vmem [resolvable:$true] %s265_s17 }
  0x16   : > { %2390 = sst [smem:[#allocation18_spill]] %s2389_s14  ;;  %s2004_s19 = smov [#allocation9]  }
  0x17   : > { %p1665_p9 = pneg %p2118_p8  ;;  %s281_s20 = sshll.u32 %s2004_s19, 4  ;;  %s282_s20 = int_to_ptr.vmem [resolvable:$true] %s281_s20 }
  0x18   : > { %s2005_s21 = smov [#allocation11]   ;;  %s1786_s23 = scalar_lea.vmem %s266_s17, 512 }
  0x19   : > { %p2127_p11 = pnand %p1665_p9, %p2380_p1  ;;  %s297_s22 = sshll.u32 %s2005_s21, 4  ;;  %s298_s22 = int_to_ptr.vmem [resolvable:$true] %s297_s22 }
  0x1a   : > { %p1787_p13 = scmp.ne.s32.totalorder %s266_s17, %s1786_s23  ;;  %p1794_p5 = scmp.lt.s32.totalorder %s266_s17, %s266_s17 }
  0x1b   : > { %p1777_p12 = pneg %p2127_p11  ;;  %p1795_p7 = scmp.lt.s32.totalorder %s1786_s23, %s1786_s23 }
  0x1d   : > { %p1789_p0 = pnand %p1787_p13, %p1777_p12  ;;  %p1796_p9 = por %p1795_p7, %p1794_p5 }
  0x1f   : > { %p1790_p3 = pneg %p1789_p0 }
  0x21   : > { %p1797_p10 = pnand %p1796_p9, %p1790_p3 }
  0x23   : > { %1800 = shalt.err (!%p1797_p10)
}
  0x24   : > { %s2006_s24 = smov 128   ;;  %s2007_s25 = smov 8  }
  0x25   : > { %s2393_s2 = sld [smem:[#allocation21_spill]]  ;;  %s1812_s16 = scalar_lea.vmem %s282_s20, 512 }
  0x26   : > { %p1813_p1 = scmp.ne.s32.totalorder %s282_s20, %s1812_s16  ;;  %p1820_p2 = scmp.lt.s32.totalorder %s282_s20, %s282_s20 }
  0x27   : > { %p1821_p6 = scmp.lt.s32.totalorder %s1812_s16, %s1812_s16 }
  0x28   : > { %p1815_p13 = pnand %p1813_p1, %p1777_p12 }
  0x29   : > { %p1822_p5 = por %p1821_p6, %p1820_p2 }
  0x2a   : > { %p1816_p0 = pneg %p1815_p13 }
  0x2b   : > { %1668 = dma.hbm_to_vmem [thread:$0]  (!%p2127_p11), %s2393_s2, 512, %s266_s17, [#allocation7], %s2006_s24, %s2006_s24, %s2007_s25  }
  0x2c   : > { %p1823_p3 = pnand %p1822_p5, %p1816_p0 }
  0x2e   : > { %1826 = shalt.err (!%p1823_p3)
}
  0x2f   : > { %s2394_s4 = sld [smem:[#allocation22_spill]]  ;;  %s1838_s17 = scalar_lea.vmem %s298_s22, 512 }
  0x30   : > { %p1839_p10 = scmp.ne.s32.totalorder %s298_s22, %s1838_s17  ;;  %p1846_p9 = scmp.lt.s32.totalorder %s298_s22, %s298_s22 }
  0x31   : > { %p1847_p13 = scmp.lt.s32.totalorder %s1838_s17, %s1838_s17 }
  0x32   : > { %p1841_p7 = pnand %p1839_p10, %p1777_p12 }
  0x33   : > { %p1848_p4 = por %p1847_p13, %p1846_p9 }
  0x34   : > { %p1842_p1 = pneg %p1841_p7 }
  0x35   : > { %1671 = dma.hbm_to_vmem [thread:$0]  (!%p2127_p11), %s2394_s4, 512, %s282_s20, [#allocation10], %s2006_s24, %s2006_s24, %s2007_s25  }
  0x36   : > { %p1849_p2 = pnand %p1848_p4, %p1842_p1 }
  0x38   : > { %1852 = shalt.err (!%p1849_p2)
}
  0x39   : > { %s2395_s6 = sld [smem:[#allocation23_spill]]  ;;  %s49_s20 = sadd.s32 1, %s1989_s29 }
  0x3a   : > { %s40_s12 = sadd.s32 1, %s1997_s9  ;;  %p56_p4 = scmp.ne.s32.totalorder %s1989_s29, %s1985_s28 }
  0x3b   : > { %p42_p6 = scmp.ge.s32.totalorder %s40_s12, 2  ;;  %p57_p12 = scmp.eq.s32.totalorder %s2001_s10, 0 }
  0x3c   : > { %p2396_p0 = scmp.eq.s32.totalorder %s2099_s11, 1  ;;  %p1689_p3 = scmp.lt.s32.totalorder %s2001_s10, 2 }
  0x3d   : > { %s2416_s12 = smov (%p42_p6, %s40_s12), 0  ;;  %p58_p10 = por %p57_p12, %p56_p4 }
  0x3e   : > { %p2164_p5 = por %p2396_p0, %p56_p4  ;;  %2398 = sst [smem:[#allocation19_spill]] %s2416_s12 }
  0x3f   : > { %1674 = dma.hbm_to_vmem [thread:$0]  (!%p2127_p11), %s2395_s6, 512, %s298_s22, [#allocation10], %s2006_s24, %s2006_s24, %s2007_s25  }
  0x40   : > { %s314_s16 = sand.u32 1, %s1989_s29   ;;  %s44_s19 = ssub.s32 %s1997_s9, %s2416_s12 }
  0x41   : > { %p47_p11 = scmp.eq.s32.totalorder %s44_s19, 0  ;;  %s1510_s22 = sshll.u32 %s314_s16, 3 }
  0x42   : > { %s1511_s24 = sshll.u32 %s1997_s9, 7  ;;  %s2399_s0 = sld [smem:[#allocation20_spill]] }
  0x43   : > { %s2176_s25 = scalar_select %p47_p11, %s1989_s29, %s49_s20  }
  0x44   : > { %s318_s26 = scalar_lea.vmem [#allocation3], %s1510_s22  ;;  %p2183_p7 = pnand %p1689_p3, %p58_p10 }
  0x45   : > { %s326_s2 = sshll.u32 %s318_s26, 4  ;;  %s2190_s19 = scalar_lea.hbm %s2372_s1, %s1511_s24  ;;  %s327_s2 = int_to_ptr.vmem [resolvable:$true] %s326_s2 }
  0x46   : > { %s333_s20 = sand.u32 1, %s2001_s10   ;;  %s315_s12 = scalar_lea.sflag [#allocation4], %s314_s16 }
  0x47   : > { %p1855_p1 = pneg %p2183_p7  ;;  %s1866_s21 = scalar_lea.vmem %s327_s2, 128 }
  0x48   : > { %s324_s23 = scalar_lea.hbm %s2399_s0, %s1511_s24  ;;  %p1867_p9 = scmp.ne.s32.totalorder %s327_s2, %s1866_s21 }
  0x49   : > { %s2008_s17 = smov [#allocation3]  }
  0x4a   : > { %p1869_p13 = pnand %p1867_p9, %p1855_p1  ;;  %s1871_s26 = sshll.u32 %s2008_s17, 4  ;;  %s1872_s26 = int_to_ptr.vmem [resolvable:$false] %s1871_s26 }
  0x4b   : > { %s1873_s0 = scalar_lea.vmem %s1872_s26, 256  ;;  %p1874_p4 = scmp.lt.s32.totalorder %s327_s2, %s1872_s26 }
  0x4c   : > { %p1870_p2 = pneg %p1869_p13  ;;  %p1875_p6 = scmp.lt.s32.totalorder %s1873_s0, %s1866_s21 }
  0x4e   : > { %p1876_p12 = por %p1875_p6, %p1874_p4 }
  0x50   : > { %p1877_p0 = pnand %p1876_p12, %p1870_p2 }
  0x52   : > { %1880 = shalt.err (!%p1877_p0)
}
  0x53   : > { %1678 = dma.hbm_to_vmem [thread:$0]  (!%p2183_p7), %s324_s23, 128, %s327_s2, %s315_s12  }
  0x54   : > { %s337_s6 = scalar_lea.vmem [#allocation6], %s1510_s22  ;;  %s334_s16 = scalar_lea.sflag [#allocation7], %s333_s20 }
  0x55   : > { %s344_s14 = sshll.u32 %s337_s6, 4  ;;  %s2009_s17 = smov [#allocation6]   ;;  %s345_s14 = int_to_ptr.vmem [resolvable:$true] %s344_s14 }
  0x56   : > { %s1894_s24 = scalar_lea.vmem %s345_s14, 128  ;;  %s1899_s26 = sshll.u32 %s2009_s17, 4  ;;  %s1900_s26 = int_to_ptr.vmem [resolvable:$false] %s1899_s26 }
  0x57   : > { %p1895_p3 = scmp.ne.s32.totalorder %s345_s14, %s1894_s24  ;;  %s1901_s0 = scalar_lea.vmem %s1900_s26, 256 }
  0x58   : > { %p1902_p9 = scmp.lt.s32.totalorder %s345_s14, %s1900_s26  ;;  %p1903_p13 = scmp.lt.s32.totalorder %s1901_s0, %s1894_s24 }
  0x59   : > { %p1897_p10 = pnand %p1895_p3, %p1855_p1 }
  0x5a   : > { %p1904_p2 = por %p1903_p13, %p1902_p9 }
  0x5b   : > { %p1898_p11 = pneg %p1897_p10 }
  0x5d   : > { %p1905_p4 = pnand %p1904_p2, %p1898_p11 }
  0x5f   : > { %1908 = shalt.err (!%p1905_p4)
}
  0x60   : > { %1681 = dma.hbm_to_vmem [thread:$0]  (!%p2183_p7), %s2190_s19, 128, %s345_s14, %s334_s16  }
  0x61   : > { %353 = sbr.rel (%p2118_p8) target bundleno = 1477 (0x5c5), region = 52  ;;  %s2209_s2 = sand.u32 (!%p2118_p8), 1, %s1985_s28  }
  0x62   : > { %s2212_s12 = sshll.u32 (!%p2118_p8), %s2209_s2, 3  ;;  %s356_s22 = scalar_lea.sflag (!%p2118_p8), [#allocation4], %s2209_s2 }
  0x63   : > { %s359_s23 = scalar_lea.vmem (!%p2118_p8), [#allocation3], %s2212_s12  ;;  %p2401_p1 = scmp.ne.s32.totalorder (!%p2118_p8), %s2388_s13, 0 }
  0x66   : > { %1960 = dma.done.wait (%p2401_p1), %s356_s22, 128  }
  0x67   : > { %1962 = vsyncadd (%p2401_p1), %s356_s22, 4294967168  ;;  %s364_s4 = sand.u32 1, %s2099_s11   ;;  %s368_s19 = scalar_lea.vmem [#allocation6], %s2212_s12 }
  0x68   : > { %s365_s15 = scalar_lea.sflag [#allocation7], %s364_s4 }
  0x69   : > { %1964 = dma.done.wait (%p2401_p1), %s365_s15, 128  }
  0x6a   : > { %1966 = vsyncadd (%p2401_p1), %s365_s15, 4294967168  ;;  %p2402_p8 = scmp.eq.s32.totalorder %s2099_s11, 0 }
  0x6c   : > { %1968 = dma.done.wait (%p2402_p8), [#allocation7], 512   ;;  %p2403_p7 = pmov %p2402_p8 }
  0x6e   : > { %1970 = vsyncadd (%p2403_p7), [#allocation7], 4294966784  ;;  %p2404_p6 = pmov %p2403_p7 }
  0x70   : > { %1972 = dma.done.wait (%p2404_p6), [#allocation10], 1024   ;;  %p2405_p12 = pmov %p2404_p6 }
  0x71   : > { %v2010_v0 = vmov 0.0   ;;  %vm2011_vm0 = vmmov 0   ;;  %v508_v1 = vld [vmem:[#allocation9 + $0x18] sm:$0xff]  ;;  %v507_v3 = vld [vmem:[#allocation9 + $0x10] sm:$0xff]  ;;  %v506_v5 = vld [vmem:[#allocation9 + $0x8] sm:$0xff]  ;;  %vm431_vm1 = vcmask 261120  }
  0x72   : > { %1974 = vsyncadd (%p2405_p12), [#allocation10], 4294966272  ;;  %1585 = vmatprep.subr.mxu1 %v2010_v0  ;;  %1574 = vmatprep.subr.mxu0 %v2010_v0  ;;  %v423_v2 = vld [vmem:[#allocation8 + $0x18] sm:$0xff]  ;;  %v422_v4 = vld [vmem:[#allocation8 + $0x10] sm:$0xff]  ;;  %vm589_vm2 = vcmask 64512   ;;  %s2012_s6 = smov 112  }
  0x73   : > { %1593 = vmatprep.mubr.msk.f32.mxu1 %vm2011_vm0, %v2010_v0  ;;  %1582 = vmatprep.mubr.msk.f32.mxu0 %vm2011_vm0, %v2010_v0  ;;  %v421_v6 = vld [vmem:[#allocation8 + $0x8] sm:$0xff]  ;;  %v505_v7 = vld [vmem:[#allocation9] sm:$0xff]  ;;  %v419_v9 = vld [vmem:[%s368_s19] sm:$0xff]  ;;  %s2013_s14 = smov 120   ;;  %s2014_s16 = smov 104   ;;  %vm925_vm3 = vcmask 130112  }
  0x74   : > { %1586 = vmatpush3.msra.mxu1 %v508_v1  ;;  %1575 = vmatpush3.msra.mxu0 %v423_v2  ;;  %v420_v8 = vld [vmem:[#allocation8] sm:$0xff]  ;;  %v1523_v11 = vld [vmem:[%s2376_s5] ss:$0 sm:$0xff]  ;;  %s2015_s24 = smov 96   ;;  %s2016_s17 = smov 80   ;;  %vm1097_vm4 = vcmask 195712  }
  0x75   : > { %1587 = vmatprep.subr.mxu1 %v2010_v0  ;;  %1576 = vmatprep.subr.mxu0 %v2010_v0  ;;  %v418_v10 = vld [vmem:[%s359_s23] sm:$0xff]  ;;  %v1521_v13 = vld [vmem:[%s2374_s3] ss:$0 sm:$0xff]  ;;  %s2017_s26 = smov 72   ;;  %s2018_s0 = smov 88   ;;  %vm1269_vm5 = vcmask 261312  }
  0x76   : > { %1588 = vmatpush3.msra.mxu1 %v507_v3  ;;  %1577 = vmatpush3.msra.mxu0 %v422_v4  ;;  %s2019_s22 = smov 8   ;;  %s2020_s23 = smov 16  }
  0x77   : > { %1589 = vmatprep.subr.mxu1 %v2010_v0  ;;  %1578 = vmatprep.subr.mxu0 %v2010_v0  ;;  %s2021_s4 = smov 24   ;;  %s1540_s11 = sshll.u32 %s1993_s30, 7 }
  0x78   : > { %1590 = vmatpush3.msra.mxu1 %v506_v5  ;;  %1579 = vmatpush3.msra.mxu0 %v421_v6  ;;  %s417_s13 = scalar_lea.vmem [#allocation12], %s2212_s12  ;;  %s2022_s30 = smov [#allocation12]  }
  0x79   : > { %1591 = vmatprep.subr.mxu1 %v2010_v0  ;;  %1580 = vmatprep.subr.mxu0 %v2010_v0  ;;  %s1372_s20 = sshll.u32 %s417_s13, 4  ;;  %s1913_s12 = sshll.u32 %s2022_s30, 4  ;;  %s1373_s20 = int_to_ptr.vmem [resolvable:$true] %s1372_s20  ;;  %s1914_s12 = int_to_ptr.vmem [resolvable:$false] %s1913_s12 }
  0x7a   : > { %1592 = vmatpush3.msra.mxu1 %v505_v7  ;;  %1581 = vmatpush3.msra.mxu0 %v420_v8  ;;  %p1916_p11 = scmp.lt.s32.totalorder %s1373_s20, %s1914_s12 }
  0x7b   : > { %1594 = vmatmul.mubr.msk.f32.vlgmr.msra.gmra.mxu1 %vm431_vm1, %v419_v9  ;;  %1583 = vmatmul.mubr.msk.f32.vlgmr.msra.gmra.mxu0 %vm431_vm1, %v418_v10 }
  0x7c   : > { %1596 = vmatprep.subr.mxu1 %v2010_v0  ;;  %1598 = vmatprep.mubr.msk.f32.mxu1 %vm2011_vm0, %v2010_v0 }
  0x7d   : > { %1606 = vmatprep.subr.mxu0 %v2010_v0  ;;  %1608 = vmatprep.mubr.msk.f32.mxu0 %vm2011_vm0, %v2010_v0 }
 0x13b   : > { %v585_v12 = vpop.f32.mrf.mxu1  ;;  %v501_v14 = vpop.f32.mrf.mxu0 }
 0x13c   : > { %v2264_v15 = vadd.f32 %v1523_v11, %v585_v12  ;;  %v502_v18 = vadd.f32 %v1521_v13, %v501_v14 }
 0x13d   : > { %v1595_v16 = vpop.f32.mrf.mxu1  ;;  %v1584_v17 = vpop.f32.mrf.mxu0 }
 0x13e   : > { %929 = vrot.lane.b32.xlu1 %v2264_v15, %s2012_s6  ;;  %757 = vrot.lane.b32.xlu0 %v2264_v15, %s2013_s14  ;;  %v1275_v16 = vld [vmem:[#allocation11 + $0x18] sm:$0xff]  ;;  %v1274_v17 = vld [vmem:[#allocation11 + $0x10] sm:$0xff] }
 0x13f   : > { %1597 = vmatpush3.xpose.msk.msra.mxu1 %vm589_vm2, %v2264_v15 }
 0x140   : > { %1601 = vmatprep.subr.mxu1 %v2010_v0 }
 0x142   : > { %1599 = vmatmul.mubr.msk.f32.vlgmr.msra.gmra.mxu1 %vm589_vm2, %v502_v18  ;;  %927 = vrot.lane.b32.xlu1 %v502_v18, %s2012_s6 }
 0x143   : > { %755 = vrot.lane.b32.xlu0 %v502_v18, %s2013_s14  ;;  %1603 = vmatprep.mubr.msk.f32.mxu1 %vm2011_vm0, %v2010_v0  ;;  %s2328_s14 = scalar_lea.hbm %s2379_s8, %s1540_s11 }
 0x146   : > { %1099 = vrot.lane.b32.xlu1 %v502_v18, %s2014_s16  ;;  %v1273_v18 = vld [vmem:[#allocation11 + $0x8] sm:$0xff] }
 0x147   : > { %1101 = vrot.lane.b32.xlu0 %v2264_v15, %s2014_s16  ;;  %s1358_s16 = scalar_lea.sflag [#allocation5], %s2209_s2 }
 0x1b0   : > { %v758_v19 = vpop.permute.xlu0 %757  ;;  %v930_v20 = vpop.permute.xlu1 %929 }
 0x1b1   : > { %1607 = vmatpush3.xpose.msk.msra.mxu0 %vm589_vm2, %v758_v19 }
 0x1b2   : > { %1616 = vmatprep.subr.mxu0 %v2010_v0 }
 0x1b4   : > { %v928_v22 = vpop.permute.xlu1 %927 }
 0x1b5   : > { %v756_v21 = vpop.permute.xlu0 %755 }
 0x1b6   : > { %1609 = vmatmul.mubr.msk.f32.vlgmr.msra.gmra.mxu0 %vm589_vm2, %v756_v21 }
 0x1b7   : > { %1617 = vmatpush3.xpose.msk.msra.mxu0 %vm589_vm2, %v930_v20  ;;  %1618 = vmatprep.mubr.msk.f32.mxu0 %vm2011_vm0, %v2010_v0  ;;  %v1272_v20 = vld [vmem:[#allocation11] sm:$0xff] }
 0x1b8   : > { %1626 = vmatprep.subr.mxu0 %v2010_v0  ;;  %v1100_v24 = vpop.permute.xlu1 %1099 }
 0x1b9   : > { %v1102_v23 = vpop.permute.xlu0 %1101 }
 0x1ba   : > { %1619 = vmatmul.mubr.msk.f32.vlgmr.msra.gmra.mxu0 %vm589_vm2, %v928_v22 }
 0x1bb   : > { %1627 = vmatpush3.xpose.msk.msra.mxu0 %vm589_vm2, %v1102_v23  ;;  %1628 = vmatprep.mubr.msk.f32.mxu0 %vm2011_vm0, %v2010_v0 }
 0x1bc   : > { %1636 = vmatprep.subr.mxu0 %v2010_v0 }
 0x1be   : > { %1629 = vmatmul.mubr.msk.f32.vlgmr.msra.gmra.mxu0 %vm589_vm2, %v1100_v24 }
 0x1bf   : > { %1644 = vmatprep.mubr.msk.f32.mxu0 %vm2011_vm0, %v2010_v0  ;;  %1637 = vmatpush3.msra.mxu0 %v1275_v16 }
 0x1c0   : > { %1638 = vmatprep.subr.mxu0 %v2010_v0 }
 0x1c1   : > { %1639 = vmatpush3.msra.mxu0 %v1274_v17 }
 0x1c2   : > { %1640 = vmatprep.subr.mxu0 %v2010_v0 }
 0x1c3   : > { %1641 = vmatpush3.msra.mxu0 %v1273_v18 }
 0x1c4   : > { %1642 = vmatprep.subr.mxu0 %v2010_v0 }
 0x1c5   : > { %1643 = vmatpush3.msra.mxu0 %v1272_v20 }
 0x202   : > { %v662_v25 = vpop.f32.mrf.mxu1 }
 0x203   : > { %v666_v26 = vmul.f32 0.35355338, %v662_v25 }
 0x204   : > { %v1600_v27 = vpop.f32.mrf.mxu1 }
 0x205   : > { %v667_v28 = vsel %vm589_vm2, %v666_v26, -inf }
 0x206   : > { %668 = vmax.xlane.f32.xlu0 %v667_v28 }
 0x276   : > { %v829_v29 = vpop.f32.mrf.mxu0 }
 0x277   : > { %v833_v30 = vmul.f32 0.35355338, %v829_v29  ;;  %v1537_v29 = vld [vmem:[%s2378_s7] ss:$0 sm:$0xff] }
 0x278   : > { %v1610_v31 = vpop.f32.mrf.mxu0 }
 0x279   : > { %v834_v32 = vsel %vm589_vm2, %v833_v30, -inf }
 0x27a   : > { %835 = vmax.xlane.f32.xlu1 %v834_v32  ;;  %v1001_v33 = vpop.f32.mrf.mxu0 }
 0x27b   : > { %v1005_v34 = vmul.f32 0.35355338, %v1001_v33 }
 0x27c   : > { %v1620_v35 = vpop.f32.mrf.mxu0 }
 0x27d   : > { %v1006_v36 = vsel %vm589_vm2, %v1005_v34, -inf }
 0x27e   : > { %1007 = vmax.xlane.f32.xlu0 %v1006_v36  ;;  %v1173_v37 = vpop.f32.mrf.mxu0 }
 0x27f   : > { %v1177_v38 = vmul.f32 0.35355338, %v1173_v37 }
 0x280   : > { %v1630_v39 = vpop.f32.mrf.mxu0 }
 0x281   : > { %v1178_v40 = vsel %vm589_vm2, %v1177_v38, -inf }
 0x282   : > { %1179 = vmax.xlane.f32.xlu0 %v1178_v40 }
 0x28b   : > { %678 = vrot.lane.b32.xlu1 %v2264_v15, %s2015_s24  ;;  %s1909_s24 = scalar_lea.vmem %s1373_s20, 128 }
 0x28c   : > { %p1910_p0 = scmp.ne.s32.totalorder %s1373_s20, %s1909_s24 }
 0x28e   : > { %p1911_p3 = pnand %p1910_p0, %p2164_p5 }
 0x28f   : > { %v669_v41 = vpop.xlane.xlu0 %668 }
 0x290   : > { %v670_v42 = vsub.f32 %v666_v26, %v669_v41  ;;  %p1912_p10 = pneg %p1911_p3 }
 0x292   : > { %v671_v43 = vmul.f32 1.442695, %v670_v42 }
 0x294   : > { %1759 = vpow2.f32 %v671_v43 }
 0x2a1   : > { %v1760_v44 = vpop.eup %1759 }
 0x2a2   : > { %v673_v45 = vsel %vm589_vm2, %v1760_v44, 0.0 }
 0x2af   : > { %674 = vadd.xlane.f32.xlu1 %v673_v45 }
 0x303   : > { %v836_v46 = vpop.xlane.xlu1 %835 }
 0x304   : > { %v837_v47 = vsub.f32 %v833_v30, %v836_v46 }
 0x306   : > { %v838_v48 = vmul.f32 1.442695, %v837_v47 }
 0x307   : > { %v679_v49 = vpop.permute.xlu1 %678  ;;  %v1008_v50 = vpop.xlane.xlu0 %1007 }
 0x308   : > { %1761 = vpow2.f32 %v838_v48  ;;  %v1009_v51 = vsub.f32 %v1005_v34, %v1008_v50  ;;  %1602 = vmatpush3.msra.mxu1 %v679_v49 }
 0x309   : > { %1611 = vmatprep.subr.mxu1 %v2010_v0 }
 0x30a   : > { %v1010_v52 = vmul.f32 1.442695, %v1009_v51 }
 0x30b   : > { %v1180_v53 = vpop.xlane.xlu0 %1179 }
 0x30c   : > { %1763 = vpow2.f32 %v1010_v52  ;;  %v1181_v54 = vsub.f32 %v1177_v38, %v1180_v53 }
 0x30e   : > { %v1182_v55 = vmul.f32 1.442695, %v1181_v54 }
 0x310   : > { %1765 = vpow2.f32 %v1182_v55 }
 0x315   : > { %v1762_v56 = vpop.eup %1761 }
 0x316   : > { %v840_v57 = vsel %vm589_vm2, %v1762_v56, 0.0 }
 0x317   : > { %841 = vadd.xlane.f32.xlu0 %v840_v57 }
 0x319   : > { %v1764_v58 = vpop.eup %1763 }
 0x31a   : > { %v1012_v59 = vsel %vm589_vm2, %v1764_v58, 0.0 }
 0x31b   : > { %1013 = vadd.xlane.f32.xlu1 %v1012_v59 }
 0x31d   : > { %v1766_v60 = vpop.eup %1765 }
 0x31e   : > { %v1184_v61 = vsel %vm589_vm2, %v1766_v60, 0.0 }
 0x31f   : > { %1185 = vadd.xlane.f32.xlu0 %v1184_v61 }
 0x32c   : > { %1017 = vrot.lane.b32.xlu1 %v2264_v15, %s2016_s17  ;;  %s1915_s17 = scalar_lea.vmem %s1914_s12, 256 }
 0x32d   : > { %p1917_p9 = scmp.lt.s32.totalorder %s1915_s17, %s1909_s24 }
 0x32f   : > { %p1918_p13 = por %p1917_p9, %p1916_p11 }
 0x330   : > { %1189 = vrot.lane.b32.xlu1 %v2264_v15, %s2017_s26 }
 0x331   : > { %p1919_p2 = pnand %p1918_p13, %p1912_p10 }
 0x335   : > { %845 = vrot.lane.b32.xlu0 %v2264_v15, %s2018_s0 }
 0x338   : > { %v675_v62 = vpop.xlane.xlu1 %674 }
 0x339   : > { %1767 = vrcp.f32 %v675_v62 }
 0x346   : > { %v1768_v63 = vpop.eup %1767 }
 0x347   : > { %v677_v1 = vmul.f32 %v1768_v63, %v1760_v44 }
 0x349   : > { %1604 = vmatmul.mubr.msk.f32.vlgmr.msra.gmra.mxu1 %vm589_vm2, %v677_v1 }
 0x34a   : > { %1613 = vmatprep.mubr.msk.f32.mxu1 %vm2011_vm0, %v2010_v0 }
 0x3a0   : > { %v842_v2 = vpop.xlane.xlu0 %841 }
 0x3a1   : > { %1769 = vrcp.f32 %v842_v2 }
 0x3a4   : > { %v1014_v3 = vpop.xlane.xlu1 %1013 }
 0x3a5   : > { %1771 = vrcp.f32 %v1014_v3 }
 0x3a8   : > { %v1186_v4 = vpop.xlane.xlu0 %1185  ;;  %v1018_v7 = vpop.permute.xlu1 %1017 }
 0x3a9   : > { %1773 = vrcp.f32 %v1186_v4 }
 0x3ac   : > { %v846_v5 = vpop.permute.xlu0 %845  ;;  %v1190_v11 = vpop.permute.xlu1 %1189 }
 0x3ad   : > { %1612 = vmatpush3.msra.mxu1 %v846_v5 }
 0x3ae   : > { %v1770_v6 = vpop.eup %1769  ;;  %1621 = vmatprep.subr.mxu1 %v2010_v0 }
 0x3af   : > { %v844_v8 = vmul.f32 %v1770_v6, %v1762_v56 }
 0x3b1   : > { %1614 = vmatmul.mubr.msk.f32.vlgmr.msra.gmra.mxu1 %vm589_vm2, %v844_v8 }
 0x3b2   : > { %v1772_v9 = vpop.eup %1771  ;;  %1622 = vmatpush3.msra.mxu1 %v1018_v7  ;;  %1623 = vmatprep.mubr.msk.f32.mxu1 %vm2011_vm0, %v2010_v0 }
 0x3b3   : > { %1631 = vmatprep.subr.mxu1 %v2010_v0  ;;  %v1016_v10 = vmul.f32 %v1772_v9, %v1764_v58 }
 0x3b5   : > { %1624 = vmatmul.mubr.msk.f32.vlgmr.msra.gmra.mxu1 %vm589_vm2, %v1016_v10 }
 0x3b6   : > { %v1774_v12 = vpop.eup %1773  ;;  %1632 = vmatpush3.msra.mxu1 %v1190_v11  ;;  %1633 = vmatprep.mubr.msk.f32.mxu1 %vm2011_vm0, %v2010_v0 }
 0x3b7   : > { %v1188_v13 = vmul.f32 %v1774_v12, %v1766_v60 }
 0x3b9   : > { %1634 = vmatmul.mubr.msk.f32.vlgmr.msra.gmra.mxu1 %vm589_vm2, %v1188_v13 }
 0x409   : > { %v750_v14 = vpop.f32.mrf.mxu1 }
 0x40a   : > { %754 = vst.msk [vmem:[#allocation2] sm:$0xff] %vm589_vm2, %v750_v14 }
 0x40b   : > { %v1605_v15 = vpop.f32.mrf.mxu1 }
 0x471   : > { %v917_v19 = vpop.f32.mrf.mxu1 }
 0x472   : > { %922 = vrot.lane.b32.xlu0 %v917_v19, %s2019_s22 }
 0x473   : > { %v1615_v21 = vpop.f32.mrf.mxu1 }
 0x475   : > { %v1089_v22 = vpop.f32.mrf.mxu1 }
 0x476   : > { %1094 = vrot.lane.b32.xlu1 %v1089_v22, %s2020_s23 }
 0x477   : > { %v1625_v23 = vpop.f32.mrf.mxu1 }
 0x479   : > { %v1261_v24 = vpop.f32.mrf.mxu1 }
 0x47a   : > { %1266 = vrot.lane.b32.xlu0 %v1261_v24, %s2021_s4 }
 0x47b   : > { %v1635_v25 = vpop.f32.mrf.mxu1 }
 0x4e4   : > { %v923_v26 = vpop.permute.xlu0 %922 }
 0x4e5   : > { %926 = vst.msk [vmem:[#allocation2] sm:$0xff] %vm925_vm3, %v923_v26 }
 0x4e8   : > { %v1095_v27 = vpop.permute.xlu1 %1094 }
 0x4e9   : > { %1098 = vst.msk [vmem:[#allocation2] sm:$0xff] %vm1097_vm4, %v1095_v27 }
 0x4ec   : > { %v1267_v0 = vpop.permute.xlu0 %1266 }
 0x4ed   : > { %1270 = vst.msk [vmem:[#allocation2] sm:$0xff] %vm1269_vm5, %v1267_v0 }
 0x4f4   : > { %v1271_v28 = vld [vmem:[#allocation2] sm:$0xff] }
 0x4f5   : > { %1645 = vmatmul.mubr.msk.f32.vlgmr.msra.gmra.mxu0 %vm431_vm1, %v1271_v28 }
 0x5b5   : > { %v1352_v30 = vpop.f32.mrf.mxu0 }
 0x5b6   : > { %v1353_v31 = vadd.f32 %v1537_v29, %v1352_v30 }
 0x5b7   : > { %v1646_v32 = vpop.f32.mrf.mxu0 }
 0x5b8   : > { %1356 = vst.msk [vmem:[%s417_s13] sm:$0xff] %vm431_vm1, %v1353_v31 }
 0x5b9   : > { %1922 = shalt.err (!%p1919_p2)
}
 0x5ba   : > { %s1923_s26 = scalar_lea.hbm %s2328_s14, 128  ;;  %s1927_s22 = scalar_lea.hbm %s2379_s8, 256 }
 0x5bb   : > { %p1924_p4 = scmp.ne.s32.totalorder %s2328_s14, %s1923_s26  ;;  %p1928_p7 = scmp.lt.s32.totalorder %s2328_s14, %s2379_s8 }
 0x5bc   : > { %p1929_p6 = scmp.lt.s32.totalorder %s1927_s22, %s1923_s26 }
 0x5bd   : > { %p1925_p1 = pnand %p1924_p4, %p2164_p5 }
 0x5be   : > { %p1930_p12 = por %p1929_p6, %p1928_p7 }
 0x5bf   : > { %p1926_p8 = pneg %p1925_p1 }
 0x5c1   : > { %p1931_p0 = pnand %p1930_p12, %p1926_p8 }
 0x5c3   : > { %1934 = shalt.err (!%p1931_p0)
}
 0x5c4   : > { %1663 = dma.vmem_to_hbm [thread:$0]  (%p2164_p5), %s1373_s20, 128, %s2328_s14, %s1358_s16  }
 0x5c5 PF: > { %s2406_s15 = sld [smem:[#allocation18_spill]]  ;;  %s1384_s19 = sand.u32 1, %s1981_s27  }
 0x5c6   : > { %p2408_p10 = scmp.ge.s32.totalorder %s2001_s10, 2  ;;  %s1385_s11 = scalar_lea.sflag [#allocation5], %s1384_s19 }
 0x5cb   : > { %p2407_p3 = scmp.ne.s32.totalorder %s2406_s15, 0 }
 0x5cd   : > { %p1683_p11 = pnand %p2408_p10, %p2407_p3 }
 0x5cf   : > { %p1684_p9 = pneg %p1683_p11 }
 0x5d1   : > { %1976 = dma.done.wait (%p1684_p9), %s1385_s11, 128  }
 0x5d2   : > { %1978 = vsyncadd (%p1684_p9), %s1385_s11, 4294967168  ;;  %s28_s10 = sadd.s32 1, %s2001_s10   ;;  %s2409_s18 = sld [smem:[#allocation19_spill]] }
 0x5d3   : > { %p25_p13 = scmp.ge.s32.totalorder %s28_s10, 4   ;;  %s2410_s27 = smov %s1985_s28 }
 0x5d4   : > { %s2411_s28 = smov %s1989_s29  ;;  %s2412_s29 = smov %s2176_s25 }
 0x5d5   : > { %s2413_s30 = smov %s1997_s9  ;;  %27 = sbr.rel (!%p25_p13) target bundleno = 14 (0xe), region = 122 }
 0x5d8   : > { %s2414_s9 = smov %s2409_s18 }
 0x5da   :  { %1390 = vsyncpa [#allocation4], 1 }
 0x5db   :  { %1392 = vsyncpa [#allocation4 + $0x1], 1 }
 0x5dc   :  { %1393 = vsyncpa [#allocation7], 1 }
 0x5dd   :  { %1395 = vsyncpa [#allocation7 + $0x1], 1 }
 0x5de   :  { %1396 = vsyncpa [#allocation10], 1 }
 0x5df   :  { %1397 = vsyncpa [#allocation5], 1 }
 0x5e0   :  { %1399 = vsyncpa [#allocation5 + $0x1], 1 }

</bundles_post_ra>
